<compile_context>
chip_gen: v7x
topology: tpu7x:2x2x1
jax: 0.10.0
libtpu: 0.0.40
codegen_flags: <defaults>
</compile_context>

<pallas_src>
import functools

import jax
import jax.numpy as jnp
from jax.experimental import pallas as pl
from jax.experimental.pallas import tpu as pltpu


def _round_up(x, m):
    return ((x + m - 1) // m) * m


def convent_block_kernel(x_ref, w_ref, b_ref, o_ref, acc_ref):
    # x_ref: (tm, tk), w_ref: (tk, tn), b_ref: (1, tn), o_ref: (tm, tn)
    k = pl.program_id(2)

    @pl.when(k == 0)
    def _():
        acc_ref[...] = jnp.zeros_like(acc_ref)

    acc_ref[...] += jnp.dot(
        x_ref[...], w_ref[...], preferred_element_type=jnp.float32
    )

    @pl.when(k == pl.num_programs(2) - 1)
    def _():
        # Bias + tanh only once per output tile (not once per K step).
        o_ref[...] = jnp.tanh(acc_ref[...] + b_ref[...]).astype(o_ref.dtype)


@functools.partial(jax.jit, static_argnames=("tm", "tn", "tk", "compute_dtype"))
def convent_block(x, weight, bias, *, tm=256, tn=256, tk=512,
                  compute_dtype=None):
    """Forward pass of ConventBlock: tanh(x @ weight.T + bias).

    x:      (M, in_N)
    weight: (out_N, in_N)   (PyTorch nn.Linear convention)
    bias:   (out_N,)
    compute_dtype: optionally jnp.bfloat16 for the MXU inputs on v6e/v7x
                   (accumulation stays float32).
    """
    M, in_N = x.shape
    out_N = weight.shape[0]
    out_dtype = x.dtype

    # Effective tiles: lane-dense (multiples of 128 on K/N), sublane-friendly
    # on M (multiple of 16 so a bf16 path also packs cleanly), but never
    # larger than the (padded) problem itself.
    tm_eff = min(tm, _round_up(M, 16))
    tk_eff = min(tk, _round_up(in_N, 128))
    tn_eff = min(tn, _round_up(out_N, 128))

    M_p = _round_up(M, tm_eff)
    K_p = _round_up(in_N, tk_eff)
    N_p = _round_up(out_N, tn_eff)

    # Glue (plain JAX): transpose weight to (in_N, out_N), zero-pad to tile
    # multiples.  Zero K-padding is exact; padded rows/cols are sliced off.
    w_t = weight.T
    if compute_dtype is not None:
        x = x.astype(compute_dtype)
        w_t = w_t.astype(compute_dtype)
    x_p = jnp.pad(x, ((0, M_p - M), (0, K_p - in_N)))
    w_p = jnp.pad(w_t, ((0, K_p - in_N), (0, N_p - out_N)))
    b_p = jnp.pad(bias.astype(jnp.float32).reshape(1, out_N),
                  ((0, 0), (0, N_p - out_N)))

    grid = (M_p // tm_eff, N_p // tn_eff, K_p // tk_eff)

    cost = pl.CostEstimate(
        flops=2 * M_p * K_p * N_p,
        transcendentals=M_p * N_p,
        bytes_accessed=(x_p.size * x_p.dtype.itemsize
                        + w_p.size * w_p.dtype.itemsize
                        + M_p * N_p * jnp.dtype(out_dtype).itemsize),
    )

    out_p = pl.pallas_call(
        convent_block_kernel,
        out_shape=jax.ShapeDtypeStruct((M_p, N_p), out_dtype),
        grid_spec=pltpu.PrefetchScalarGridSpec(
            num_scalar_prefetch=0,
            grid=grid,
            in_specs=[
                pl.BlockSpec((tm_eff, tk_eff), lambda i, j, k: (i, k)),  # x
                pl.BlockSpec((tk_eff, tn_eff), lambda i, j, k: (k, j)),  # W^T
                pl.BlockSpec((1, tn_eff), lambda i, j, k: (0, j)),       # bias
            ],
            out_specs=pl.BlockSpec((tm_eff, tn_eff), lambda i, j, k: (i, j)),
            scratch_shapes=[pltpu.VMEM((tm_eff, tn_eff), jnp.float32)],
        ),
        compiler_params=pltpu.CompilerParams(
            dimension_semantics=("parallel", "parallel", "arbitrary"),
            vmem_limit_bytes=48 * 1024 * 1024,  # safe on v5e/v6e/v7x
        ),
        cost_estimate=cost,
    )(x_p, w_p, b_p)

    return out_p[:M, :out_N]


def convent_block_ref(x, weight, bias):
    return jnp.tanh(x @ weight.T + bias)


if __name__ == "__main__":
    key = jax.random.PRNGKey(0)
    k_x, k_w, k_b = jax.random.split(key, 3)

    # Small shapes consistent with the module (Linear on last dim).
    batch, in_N, out_N = 16, 32, 32

    x = jax.random.normal(k_x, (batch, in_N), dtype=jnp.float32)
    # Deterministic synthetic parameters (shapes from nn.Linear(in_N, out_N)).
    weight = jax.random.normal(k_w, (out_N, in_N), dtype=jnp.float32) * 0.1
    bias = jax.random.normal(k_b, (out_N,), dtype=jnp.float32) * 0.1

    out = convent_block(x, weight, bias)
    out = jax.block_until_ready(out)

    ref = convent_block_ref(x, weight, bias)
    assert out.shape == (batch, out_N)
    assert jnp.allclose(out, ref, atol=1e-5, rtol=1e-5)

    # Also exercise a non-tile-divisible, larger problem to verify the
    # padded/tiled path (M not multiple of tile, K/N > 128).
    k2x, k2w, k2b = jax.random.split(jax.random.PRNGKey(1), 3)
    M2, K2, N2 = 300, 384, 200
    x2 = jax.random.normal(k2x, (M2, K2), dtype=jnp.float32)
    w2 = jax.random.normal(k2w, (N2, K2), dtype=jnp.float32) * 0.05
    b2 = jax.random.normal(k2b, (N2,), dtype=jnp.float32) * 0.05
    out2 = jax.block_until_ready(convent_block(x2, w2, b2))
    ref2 = convent_block_ref(x2, w2, b2)
    assert out2.shape == (M2, N2)
    assert jnp.allclose(out2, ref2, atol=1e-4, rtol=1e-4)

    print("KERNEL_OK")
</pallas_src>

<mosaic_0001>
module attributes {stable_mosaic.version = 11 : i64} {
  func.func @convent_block_kernel(%arg0: i32, %arg1: i32, %arg2: i32, %arg3: memref<16x128xf32, #tpu.memory_space<vmem>>, %arg4: memref<128x128xf32, #tpu.memory_space<vmem>>, %arg5: memref<1x128xf32, #tpu.memory_space<vmem>>, %arg6: memref<16x128xf32, #tpu.memory_space<vmem>>, %arg7: memref<16x128xf32, #tpu.memory_space<vmem>>) attributes {dimension_semantics = [#tpu.dimension_semantics<parallel>, #tpu.dimension_semantics<parallel>, #tpu.dimension_semantics<arbitrary>], iteration_bounds = array<i64: 1, 1, 1>, scalar_prefetch = 0 : i64, scratch_operands = 1 : i64, tpu.core_type = #tpu.core_type<tc>, window_params = [{transform_indices = @transform_0, window_bounds = array<i64: 16, 128>}, {transform_indices = @transform_1, window_bounds = array<i64: 128, 128>}, {transform_indices = @transform_2, window_bounds = array<i64: 1, 128>}, {transform_indices = @transform_3, window_bounds = array<i64: 16, 128>}]} {
    %c0_i32 = arith.constant 0 : i32
    %0 = arith.cmpi eq, %arg2, %c0_i32 : i32
    %1 = arith.extui %0 : i1 to i32
    %c0_i32_0 = arith.constant 0 : i32
    %2 = arith.cmpi ne, %1, %c0_i32_0 : i32
    scf.if %2 {
      %cst_10 = arith.constant 0.000000e+00 : f32
      %12 = vector.broadcast %cst_10 : f32 to vector<16x128xf32>
      %c0_11 = arith.constant 0 : index
      %c0_12 = arith.constant 0 : index
      %13 = vector.load %arg7[%c0_11, %c0_12] : memref<16x128xf32, #tpu.memory_space<vmem>>, vector<16x128xf32>
      tpu.vector_store %arg7[%c0_11, %c0_12], %12 {strides = array<i32>} : memref<16x128xf32, #tpu.memory_space<vmem>>, vector<16x128xf32>,
    } else {
    }
    %c0 = arith.constant 0 : index
    %c0_1 = arith.constant 0 : index
    %3 = vector.load %arg7[%c0, %c0_1] : memref<16x128xf32, #tpu.memory_space<vmem>>, vector<16x128xf32>
    %c0_2 = arith.constant 0 : index
    %c0_3 = arith.constant 0 : index
    %4 = vector.load %arg3[%c0_2, %c0_3] : memref<16x128xf32, #tpu.memory_space<vmem>>, vector<16x128xf32>
    %c0_4 = arith.constant 0 : index
    %c0_5 = arith.constant 0 : index
    %5 = vector.load %arg4[%c0_4, %c0_5] : memref<128x128xf32, #tpu.memory_space<vmem>>, vector<128x128xf32>
    %cst = arith.constant dense<0.000000e+00> : vector<16x128xf32>
    %6 = tpu.matmul %4, %5, %cst {dimension_numbers = #tpu.dot_dimension_numbers<[1], [0], [0], [1], [0, 0, 1, 1], [], []>} : vector<16x128xf32>, vector<128x128xf32>, vector<16x128xf32> -> vector<16x128xf32>
    %7 = arith.addf %3, %6 : vector<16x128xf32>
    %c0_6 = arith.constant 0 : index
    %c0_7 = arith.constant 0 : index
    %8 = vector.load %arg7[%c0_6, %c0_7] : memref<16x128xf32, #tpu.memory_space<vmem>>, vector<16x128xf32>
    tpu.vector_store %arg7[%c0_6, %c0_7], %7 {strides = array<i32>} : memref<16x128xf32, #tpu.memory_space<vmem>>, vector<16x128xf32>,
    %c0_i32_8 = arith.constant 0 : i32
    %9 = arith.cmpi eq, %arg2, %c0_i32_8 : i32
    %10 = arith.extui %9 : i1 to i32
    %c0_i32_9 = arith.constant 0 : i32
    %11 = arith.cmpi ne, %10, %c0_i32_9 : i32
    scf.if %11 {
      %c0_10 = arith.constant 0 : index
      %c0_11 = arith.constant 0 : index
      %12 = vector.load %arg7[%c0_10, %c0_11] : memref<16x128xf32, #tpu.memory_space<vmem>>, vector<16x128xf32>
      %c0_12 = arith.constant 0 : index
      %c0_13 = arith.constant 0 : index
      %13 = vector.load %arg5[%c0_12, %c0_13] : memref<1x128xf32, #tpu.memory_space<vmem>>, vector<1x128xf32>
      %14 = vector.broadcast %13 : vector<1x128xf32> to vector<16x128xf32>
      %15 = arith.addf %12, %14 : vector<16x128xf32>
      %16 = math.tanh %15 : vector<16x128xf32>
      %c0_14 = arith.constant 0 : index
      %c0_15 = arith.constant 0 : index
      %17 = vector.load %arg6[%c0_14, %c0_15] : memref<16x128xf32, #tpu.memory_space<vmem>>, vector<16x128xf32>
      tpu.vector_store %arg6[%c0_14, %c0_15], %16 {strides = array<i32>} : memref<16x128xf32, #tpu.memory_space<vmem>>, vector<16x128xf32>,
    } else {
    }
    return
  }
  func.func @transform_0(%arg0: i32, %arg1: i32, %arg2: i32) -> (i32, i32) {
    %c0_i32 = arith.constant 0 : i32
    return %arg0, %arg2 : i32, i32
  }
  func.func @transform_1(%arg0: i32, %arg1: i32, %arg2: i32) -> (i32, i32) {
    %c0_i32 = arith.constant 0 : i32
    return %arg2, %arg1 : i32, i32
  }
  func.func @transform_2(%arg0: i32, %arg1: i32, %arg2: i32) -> (i32, i32) {
    %c0_i32 = arith.constant 0 : i32
    %c0_i32_0 = arith.constant 0 : i32
    return %c0_i32, %arg1 : i32, i32
  }
  func.func @transform_3(%arg0: i32, %arg1: i32, %arg2: i32) -> (i32, i32) {
    %c0_i32 = arith.constant 0 : i32
    return %arg0, %arg1 : i32, i32
  }
}

</mosaic_0001>

<bundles_post_ra>
// kernel: convent_block.1
= control target key start
LH: loop header
LB: loop body
LE: loop exit
PB: predicated region body
PF: predicated region fallthrough
CT: control target
= control target key end

     0   :  { %s363_s0 = inlined_call_operand.vmem [shape: f32[16,128], index: 0, kind: input, shape index: {}]   ;;  %s364_s1 = inlined_call_operand.vmem [shape: f32[128,128], index: 1, kind: input, shape index: {}]   ;;  %s365_s2 = inlined_call_operand.vmem [shape: f32[1,128], index: 2, kind: input, shape index: {}]   ;;  %s366_s3 = inlined_call_operand.hbm [shape: f32[16,128], index: 3, kind: output, shape index: {}]  }
   0x1   :  { %v25_v0 = vld [vmem:[%s364_s1] sm:$0xff]  ;;  %v26_v1 = vld [vmem:[%s364_s1 + $0x8] sm:$0xff]  ;;  %v27_v2 = vld [vmem:[%s364_s1 + $0x10] sm:$0xff] }
   0x2   :  { %v208_v3 = vpack.c.bf16 %v26_v1, %v25_v0  ;;  %v28_v4 = vld [vmem:[%s364_s1 + $0x18] sm:$0xff]  ;;  %v29_v6 = vld [vmem:[%s364_s1 + $0x20] sm:$0xff]  ;;  %v30_v7 = vld [vmem:[%s364_s1 + $0x28] sm:$0xff] }
   0x3   :  { %v212_v5 = vpack.c.bf16 %v28_v4, %v27_v2  ;;  %v216_v8 = vpack.c.bf16 %v30_v7, %v29_v6  ;;  %v23_v9 = vld [vmem:[%s363_s0] sm:$0xff]  ;;  %v31_v10 = vld [vmem:[%s364_s1 + $0x30] sm:$0xff]  ;;  %v32_v11 = vld [vmem:[%s364_s1 + $0x38] sm:$0xff] }
   0x4   :  { %209 = vmatprep.subr.bf16.mxu0 %v208_v3  ;;  %205 = vmatprep.mubr.f32.mxu0 %v23_v9 }
   0x5   :  { %211 = vmatpush3.bf16.msra.mxu0 %v208_v3 }
   0x6   :  { %213 = vmatprep.subr.bf16.mxu0 %v212_v5 }
   0x7   :  { %8 = vsyncpa [#allocation4], 0  ;;  %v220_v12 = vpack.c.bf16 %v32_v11, %v31_v10  ;;  %v33_v13 = vld [vmem:[%s364_s1 + $0x40] sm:$0xff]  ;;  %v34_v14 = vld [vmem:[%s364_s1 + $0x48] sm:$0xff] }
   0x8   :  { %v224_v15 = vpack.c.bf16 %v34_v14, %v33_v13  ;;  %v35_v16 = vld [vmem:[%s364_s1 + $0x50] sm:$0xff]  ;;  %v36_v17 = vld [vmem:[%s364_s1 + $0x58] sm:$0xff]  ;;  %v37_v19 = vld [vmem:[%s364_s1 + $0x60] sm:$0xff] }
   0x9   :  { %215 = vmatpush3.bf16.msra.mxu0 %v212_v5  ;;  %v228_v18 = vpack.c.bf16 %v36_v17, %v35_v16  ;;  %v38_v20 = vld [vmem:[%s364_s1 + $0x68] sm:$0xff]  ;;  %v39_v22 = vld [vmem:[%s364_s1 + $0x70] sm:$0xff]  ;;  %v40_v23 = vld [vmem:[%s364_s1 + $0x78] sm:$0xff]  ;;  %s271_s1 = smov [#allocation3]  }
   0xa   :  { %217 = vmatprep.subr.bf16.mxu0 %v216_v8  ;;  %v232_v21 = vpack.c.bf16 %v38_v20, %v37_v19  ;;  %v236_v24 = vpack.c.bf16 %v40_v23, %v39_v22  ;;  %v24_v25 = vld [vmem:[%s363_s0 + $0x8] sm:$0xff]  ;;  %v154_v26 = vld [vmem:[%s365_s2] ss:$0 sm:$0xff]  ;;  %s143_s23 = sshll.u32 %s271_s1, 4  ;;  %s144_s23 = int_to_ptr.vmem [resolvable:$true] %s143_s23 }
   0xb   :  { %s247_s24 = scalar_lea.vmem %s144_s23, 256  ;;  %p252_p1 = scmp.lt.s32.totalorder %s144_s23, %s144_s23 }
   0xc   :  { %p248_p0 = scmp.ne.s32.totalorder %s144_s23, %s247_s24  ;;  %p253_p2 = scmp.lt.s32.totalorder %s247_s24, %s247_s24 }
   0xd   :  { %219 = vmatpush3.bf16.msra.mxu0 %v216_v8 }
   0xe   :  { %221 = vmatprep.subr.bf16.mxu0 %v220_v12  ;;  %p254_p3 = por %p253_p2, %p252_p1 }
  0x10   :  { %p255_p4 = pnand %p254_p3, %p248_p0 }
  0x11   :  { %223 = vmatpush3.bf16.msra.mxu0 %v220_v12 }
  0x12   :  { %225 = vmatprep.subr.bf16.mxu0 %v224_v15 }
  0x15   :  { %227 = vmatpush3.bf16.msra.mxu0 %v224_v15 }
  0x16   :  { %229 = vmatprep.subr.bf16.mxu0 %v228_v18 }
  0x19   :  { %231 = vmatpush3.bf16.msra.mxu0 %v228_v18 }
  0x1a   :  { %233 = vmatprep.subr.bf16.mxu0 %v232_v21 }
  0x1d   :  { %235 = vmatpush3.bf16.msra.mxu0 %v232_v21 }
  0x1e   :  { %237 = vmatprep.subr.bf16.mxu0 %v236_v24 }
  0x21   :  { %239 = vmatpush3.bf16.msra.mxu0 %v236_v24 }
  0x24   :  { %206 = vmatmul.mubr.f32.vlgmr.msra.gmra.mrb[0].mxu0 %v24_v25 }
  0xf7   :  { %v207_v27 = vpop.f32.mrb[0].mxu0 }
  0xf8   :  { %v133_v28 = vadd.f32 %v207_v27, %v154_v26  ;;  %v107_v29 = vpop.f32.mrb[1].mxu0 }
  0xf9   :  { %v132_v30 = vadd.f32 %v154_v26, %v107_v29 }
  0xfa   :  { %243 = vtanh.f32 %v133_v28 }
  0xfb   :  { %245 = vtanh.f32 %v132_v30 }
 0x104   :  { %v244_v31 = vpop.eup %243 }
 0x105   :  { %v246_v32 = vpop.eup %245  ;;  %137 = vst [vmem:[#allocation3 + $0x8] sm:$0xff] %v244_v31 }
 0x106   :  { %136 = vst [vmem:[#allocation3] sm:$0xff] %v246_v32 }
 0x107   :  { %258 = shalt.err (!%p255_p4)
}
 0x108   :  { %s259_s25 = scalar_lea.hbm %s366_s3, 256 }
 0x109   :  { %p260_p5 = scmp.ne.s32.totalorder %s366_s3, %s259_s25  ;;  %p263_p6 = scmp.lt.u32.totalorder %s259_s25, %s366_s3 }
 0x10b   :  { %p265_p7 = pnand %p263_p6, %p260_p5 }
 0x10d   :  { %268 = shalt.err (!%p265_p7)
}
 0x10e   :  { %s272_s30 = smov 128   ;;  %s273_s4 = smov 8  }
 0x10f   :  { %149 = dma.vmem_to_hbm [thread:$0]  %s144_s23, 256, %s366_s3, [#allocation4], %s272_s30, %s272_s30, %s273_s4  }
 0x110   :  { %269 = dma.done.wait [#allocation4], 256  }
 0x111   :  { %270 = vsyncadd [#allocation4], 4294967040 }
 0x112   :  { %153 = vsyncpa [#allocation4], 1 }

</bundles_post_ra>
